<compile_context>
chip_gen: v5e
topology: v5e:2x2
jax: 0.10.0
libtpu: 0.0.40
codegen_flags: <defaults>
</compile_context>

<pallas_src>
import functools

import jax
import jax.numpy as jnp
from jax.experimental import pallas as pl
from jax.experimental.pallas import tpu as pltpu


def _round_up(x, m):
    return (x + m - 1) // m * m


def _pad_to(a, rows, cols):
    return jnp.pad(a, ((0, rows - a.shape[0]), (0, cols - a.shape[1])))


def _leaky_relu(v, slope=0.01):
    return jnp.where(v > 0, v, slope * v)


def _mm(a, b):
    return jnp.dot(a, b, preferred_element_type=jnp.float32)


def model_kernel(
    x_ref, hinc_ref, hincT_ref, a_ref, dinv_ref, binv_ref,
    w1_ref, b1_ref, w2_ref, b2_ref, w3_ref, b3_ref, w4_ref, b4_ref,
    wfc_ref, bfc_ref,
    x_out_ref, y_out_ref,
):
    bf16 = jnp.bfloat16
    hp = b1_ref.shape[1]                   # padded hidden width (multiple of 128)

    hinc = hinc_ref[...]                   # (Np, Ep) bf16
    hincT = hincT_ref[...]                 # (Ep, Np) bf16
    dinv = dinv_ref[...]                   # (Np, 1)  f32
    binv = binv_ref[...]                   # (Ep, 1)  f32

    def hyper_prop(m_f32):
        # P @ M = d_inv * (H @ (b_inv * (H^T @ M)));  scalings kept in f32.
        t = _mm(hincT, m_f32.astype(bf16)) * binv          # (Ep, Hp) f32
        return _mm(hinc, t.astype(bf16)) * dinv            # (Np, Hp) f32

    # ---- Layer 1: HypergraphConv(in,H) + Linear(in,H), leaky_relu ----------
    xw = _mm(x_ref[...], w1_ref[...])                      # (Np, 2Hp) f32
    h = _leaky_relu(hyper_prop(xw[:, :hp]) + xw[:, hp:] + b1_ref[...])

    # ---- Layer 2: HypergraphConv(H,H) + Linear(H,H), leaky_relu ------------
    hw = _mm(h.astype(bf16), w2_ref[...])                  # (Np, 2Hp) f32
    h = _leaky_relu(hyper_prop(hw[:, :hp]) + hw[:, hp:] + b2_ref[...])

    # ---- Layer 3: GraphConv(H,H) + Linear(H,H), leaky_relu -----------------
    a = a_ref[...]                                         # (Np, Np) bf16
    h_bf = h.astype(bf16)
    ah = _mm(a, h_bf).astype(bf16)                         # (Np, Hp)
    z = jnp.concatenate([ah, h_bf], axis=1)                # (Np, 2Hp) bf16
    h = _leaky_relu(_mm(z, w3_ref[...]) + b3_ref[...])

    # ---- Layer 4: GraphConv(H,H) + Linear(H,H), leaky_relu -----------------
    h_bf = h.astype(bf16)
    ah = _mm(a, h_bf).astype(bf16)
    z = jnp.concatenate([ah, h_bf], axis=1)
    h = _leaky_relu(_mm(z, w4_ref[...]) + b4_ref[...])

    # ---- Final projection (lane-dense padded output) -----------------------
    x_out_ref[...] = h
    y_out_ref[...] = _mm(h.astype(bf16), wfc_ref[...]) + bfc_ref[...]


@functools.partial(jax.jit, static_argnames=("num_hyperedges",))
def model_forward(X, edge_index, hyperedge_index, params, *, num_hyperedges):
    N, Cin = X.shape
    H = params["w_lin1"].shape[1]
    Cout = params["w_fc"].shape[1]
    E = num_hyperedges
    bf16 = jnp.bfloat16

    Np = _round_up(N, 8)
    Ep = _round_up(E, 8)
    Cin_p = _round_up(Cin, 8)
    Hp = _round_up(H, 128)
    Cout_p = _round_up(Cout, 128)

    # Hypergraph incidence + degree reciprocals (PyG HypergraphConv, unit
    # hyperedge weights):  P = D^{-1} H B^{-1} H^T, kept factored.
    h_inc = jnp.zeros((N, E), jnp.float32).at[
        hyperedge_index[0], hyperedge_index[1]].add(1.0)
    deg_n = h_inc.sum(axis=1)
    deg_e = h_inc.sum(axis=0)
    d_inv = jnp.where(deg_n > 0, 1.0 / deg_n, 0.0)
    b_inv = jnp.where(deg_e > 0, 1.0 / deg_e, 0.0)

    # Dense graph adjacency A[target, source] += 1 (source_to_target, sum aggr).
    A = jnp.zeros((N, N), jnp.float32).at[edge_index[1], edge_index[0]].add(1.0)

    # --- operand packing / padding (zeros; padded rows/cols are inert) ------
    x_p = _pad_to(X.astype(jnp.float32), Np, Cin_p).astype(bf16)
    hinc_p = _pad_to(h_inc, Np, Ep).astype(bf16)
    hincT_p = _pad_to(h_inc.T, Ep, Np).astype(bf16)
    a_p = _pad_to(A, Np, Np).astype(bf16)
    dinv_p = _pad_to(d_inv[:, None], Np, 1)            # f32
    binv_p = _pad_to(b_inv[:, None], Ep, 1)            # f32

    def pw(w, r, c):
        return _pad_to(w, r, c).astype(bf16)

    def pb(b, c):
        return _pad_to(b, 1, c)                        # f32

    # layer 1/2: concat parallel weight paths along output dim, sum biases
    w1 = jnp.concatenate([pw(params["w_hg1"], Cin_p, Hp),
                          pw(params["w_lin1"], Cin_p, Hp)], axis=1)
    b1 = pb(params["b_hg1"] + params["b_lin1"], Hp)
    w2 = jnp.concatenate([pw(params["w_hg2"], Hp, Hp),
                          pw(params["w_lin2"], Hp, Hp)], axis=1)
    b2 = pb(params["b_hg2"] + params["b_lin2"], Hp)
    # layer 3/4: fuse root + extra linear (same input), stack with rel weights
    w3 = jnp.concatenate([pw(params["w_rel1"], Hp, Hp),
                          pw(params["w_root1"] + params["w_gcn_lin1"], Hp, Hp)],
                         axis=0)
    b3 = pb(params["b_rel1"] + params["b_gcn_lin1"], Hp)
    w4 = jnp.concatenate([pw(params["w_rel2"], Hp, Hp),
                          pw(params["w_root2"] + params["w_gc_lin2"], Hp, Hp)],
                         axis=0)
    b4 = pb(params["b_rel2"] + params["b_gc_lin2"], Hp)
    wfc = pw(params["w_fc"], Hp, Cout_p)
    bfc = pb(params["b_fc"], Cout_p)

    operands = (x_p, hinc_p, hincT_p, a_p, dinv_p, binv_p,
                w1, b1, w2, b2, w3, b3, w4, b4, wfc, bfc)

    # --- VMEM budget + cost estimate (advisory) ------------------------------
    def nbytes(a):
        return a.size * a.dtype.itemsize

    in_bytes = sum(nbytes(o) for o in operands)
    out_bytes = Np * Hp * 4 + Np * Cout_p * 4
    scratch_bytes = 6 * Np * 2 * Hp * 4                 # f32 intermediates headroom
    vmem_limit = int(min(64 * 1024 * 1024,
                         max(32 * 1024 * 1024,
                             2 * (in_bytes + out_bytes + scratch_bytes))))

    flops = (
        2 * Np * Cin_p * (2 * Hp)                       # layer-1 packed matmul
        + 2 * Np * Hp * (2 * Hp)                        # layer-2 packed matmul
        + 8 * Np * Ep * Hp                              # two hypergraph propagations
        + 2 * (2 * Np * Np * Hp + 2 * Np * (2 * Hp) * Hp)  # layers 3/4
        + 2 * Np * Hp * Cout_p                          # final projection
    )
    cost = pl.CostEstimate(flops=flops, transcendentals=0,
                           bytes_accessed=in_bytes + out_bytes)

    vmem_spec = pl.BlockSpec(memory_space=pltpu.MemorySpace.VMEM)
    x_out, y_out = pl.pallas_call(
        model_kernel,
        out_shape=(
            jax.ShapeDtypeStruct((Np, Hp), jnp.float32),
            jax.ShapeDtypeStruct((Np, Cout_p), jnp.float32),
        ),
        in_specs=[vmem_spec] * len(operands),
        out_specs=(vmem_spec, vmem_spec),
        compiler_params=pltpu.CompilerParams(vmem_limit_bytes=vmem_limit),
        cost_estimate=cost,
    )(*operands)

    return x_out[:N, :H], y_out[:N, :Cout]


def init_params(key, in_channels, hidden_channels, out_channels):
    """Deterministic synthetic parameter init (shapes match the PyTorch module)."""
    def lin(k, fan_in, fan_out, bias=True):
        kw, kb = jax.random.split(k)
        scale = 1.0 / jnp.sqrt(jnp.float32(fan_in))
        w = jax.random.uniform(kw, (fan_in, fan_out), jnp.float32, -scale, scale)
        b = (jax.random.uniform(kb, (1, fan_out), jnp.float32, -scale, scale)
             if bias else jnp.zeros((1, fan_out), jnp.float32))
        return w, b

    keys = jax.random.split(key, 12)
    p = {}
    p["w_hg1"], p["b_hg1"] = lin(keys[0], in_channels, hidden_channels)
    p["w_lin1"], p["b_lin1"] = lin(keys[1], in_channels, hidden_channels)
    p["w_hg2"], p["b_hg2"] = lin(keys[2], hidden_channels, hidden_channels)
    p["w_lin2"], p["b_lin2"] = lin(keys[3], hidden_channels, hidden_channels)
    p["w_rel1"], p["b_rel1"] = lin(keys[4], hidden_channels, hidden_channels)
    p["w_root1"], _ = lin(keys[5], hidden_channels, hidden_channels, bias=False)
    p["w_gcn_lin1"], p["b_gcn_lin1"] = lin(keys[6], hidden_channels, hidden_channels)
    p["w_rel2"], p["b_rel2"] = lin(keys[7], hidden_channels, hidden_channels)
    p["w_root2"], _ = lin(keys[8], hidden_channels, hidden_channels, bias=False)
    p["w_gc_lin2"], p["b_gc_lin2"] = lin(keys[9], hidden_channels, hidden_channels)
    p["w_fc"], p["b_fc"] = lin(keys[10], hidden_channels, out_channels)
    return p


if __name__ == "__main__":
    key = jax.random.PRNGKey(0)
    N, Cin, Hdim, Cout = 16, 8, 32, 4
    num_hyperedges = 6
    num_edges = 24
    nnz_hyper = 32

    k_x, k_e, k_hn, k_he, k_p = jax.random.split(key, 5)
    X = jax.random.normal(k_x, (N, Cin), jnp.float32)
    edge_index = jax.random.randint(k_e, (2, num_edges), 0, N, jnp.int32)
    hyperedge_index = jnp.stack([
        jax.random.randint(k_hn, (nnz_hyper,), 0, N, jnp.int32),
        jax.random.randint(k_he, (nnz_hyper,), 0, num_hyperedges, jnp.int32),
    ])

    params = init_params(k_p, Cin, Hdim, Cout)

    # TODO(synk): dropout is modeled as identity (inference mode).
    x_out, y_out = model_forward(
        X, edge_index, hyperedge_index, params, num_hyperedges=num_hyperedges)
    jax.block_until_ready((x_out, y_out))

    assert x_out.shape == (N, Hdim) and y_out.shape == (N, Cout)
    assert jnp.all(jnp.isfinite(x_out)) and jnp.all(jnp.isfinite(y_out))
    print("KERNEL_OK")
</pallas_src>

<mosaic_0001>
module attributes {stable_mosaic.version = 11 : i64} {
  func.func @model_kernel(%arg0: memref<16x8xbf16, #tpu.memory_space<vmem>>, %arg1: memref<16x8xbf16, #tpu.memory_space<vmem>>, %arg2: memref<8x16xbf16, #tpu.memory_space<vmem>>, %arg3: memref<16x16xbf16, #tpu.memory_space<vmem>>, %arg4: memref<16x1xf32, #tpu.memory_space<vmem>>, %arg5: memref<8x1xf32, #tpu.memory_space<vmem>>, %arg6: memref<8x256xbf16, #tpu.memory_space<vmem>>, %arg7: memref<1x128xf32, #tpu.memory_space<vmem>>, %arg8: memref<128x256xbf16, #tpu.memory_space<vmem>>, %arg9: memref<1x128xf32, #tpu.memory_space<vmem>>, %arg10: memref<256x128xbf16, #tpu.memory_space<vmem>>, %arg11: memref<1x128xf32, #tpu.memory_space<vmem>>, %arg12: memref<256x128xbf16, #tpu.memory_space<vmem>>, %arg13: memref<1x128xf32, #tpu.memory_space<vmem>>, %arg14: memref<128x128xbf16, #tpu.memory_space<vmem>>, %arg15: memref<1x128xf32, #tpu.memory_space<vmem>>, %arg16: memref<16x128xf32, #tpu.memory_space<vmem>>, %arg17: memref<16x128xf32, #tpu.memory_space<vmem>>) attributes {dimension_semantics = [], scalar_prefetch = 0 : i64, scratch_operands = 0 : i64, tpu.core_type = #tpu.core_type<tc>} {
    %c0 = arith.constant 0 : index
    %c0_0 = arith.constant 0 : index
    %0 = vector.load %arg1[%c0, %c0_0] : memref<16x8xbf16, #tpu.memory_space<vmem>>, vector<16x8xbf16>
    %c0_1 = arith.constant 0 : index
    %c0_2 = arith.constant 0 : index
    %1 = vector.load %arg2[%c0_1, %c0_2] : memref<8x16xbf16, #tpu.memory_space<vmem>>, vector<8x16xbf16>
    %c0_3 = arith.constant 0 : index
    %c0_4 = arith.constant 0 : index
    %2 = vector.load %arg4[%c0_3, %c0_4] : memref<16x1xf32, #tpu.memory_space<vmem>>, vector<16x1xf32>
    %c0_5 = arith.constant 0 : index
    %c0_6 = arith.constant 0 : index
    %3 = vector.load %arg5[%c0_5, %c0_6] : memref<8x1xf32, #tpu.memory_space<vmem>>, vector<8x1xf32>
    %c0_7 = arith.constant 0 : index
    %c0_8 = arith.constant 0 : index
    %4 = vector.load %arg0[%c0_7, %c0_8] : memref<16x8xbf16, #tpu.memory_space<vmem>>, vector<16x8xbf16>
    %c0_9 = arith.constant 0 : index
    %c0_10 = arith.constant 0 : index
    %5 = vector.load %arg6[%c0_9, %c0_10] : memref<8x256xbf16, #tpu.memory_space<vmem>>, vector<8x256xbf16>
    %cst = arith.constant dense<0.000000e+00> : vector<16x256xf32>
    %6 = tpu.matmul %4, %5, %cst {dimension_numbers = #tpu.dot_dimension_numbers<[1], [0], [0], [1], [0, 0, 1, 1], [], []>} : vector<16x8xbf16>, vector<8x256xbf16>, vector<16x256xf32> -> vector<16x256xf32>
    %7 = vector.extract_strided_slice %6 {offsets = [0, 0], sizes = [16, 128], strides = [1, 1]} : vector<16x256xf32> to vector<16x128xf32>
    %8 = arith.truncf %7 : vector<16x128xf32> to vector<16x128xbf16>
    %cst_11 = arith.constant dense<0.000000e+00> : vector<8x128xf32>
    %9 = tpu.matmul %1, %8, %cst_11 {dimension_numbers = #tpu.dot_dimension_numbers<[1], [0], [0], [1], [0, 0, 1, 1], [], []>} : vector<8x16xbf16>, vector<16x128xbf16>, vector<8x128xf32> -> vector<8x128xf32>
    %10 = vector.broadcast %3 : vector<8x1xf32> to vector<8x128xf32>
    %11 = arith.mulf %9, %10 : vector<8x128xf32>
    %12 = arith.truncf %11 : vector<8x128xf32> to vector<8x128xbf16>
    %cst_12 = arith.constant dense<0.000000e+00> : vector<16x128xf32>
    %13 = tpu.matmul %0, %12, %cst_12 {dimension_numbers = #tpu.dot_dimension_numbers<[1], [0], [0], [1], [0, 0, 1, 1], [], []>} : vector<16x8xbf16>, vector<8x128xbf16>, vector<16x128xf32> -> vector<16x128xf32>
    %14 = vector.broadcast %2 : vector<16x1xf32> to vector<16x128xf32>
    %15 = arith.mulf %13, %14 : vector<16x128xf32>
    %16 = vector.extract_strided_slice %6 {offsets = [0, 128], sizes = [16, 128], strides = [1, 1]} : vector<16x256xf32> to vector<16x128xf32>
    %17 = arith.addf %15, %16 : vector<16x128xf32>
    %c0_13 = arith.constant 0 : index
    %c0_14 = arith.constant 0 : index
    %18 = vector.load %arg7[%c0_13, %c0_14] : memref<1x128xf32, #tpu.memory_space<vmem>>, vector<1x128xf32>
    %19 = vector.broadcast %18 : vector<1x128xf32> to vector<16x128xf32>
    %20 = arith.addf %17, %19 : vector<16x128xf32>
    %cst_15 = arith.constant 0.000000e+00 : f32
    %21 = vector.broadcast %cst_15 : f32 to vector<16x128xf32>
    %22 = arith.cmpf ogt, %20, %21 : vector<16x128xf32>
    %cst_16 = arith.constant 0.00999999977 : f32
    %23 = vector.broadcast %cst_16 : f32 to vector<16x128xf32>
    %24 = arith.mulf %23, %20 : vector<16x128xf32>
    %25 = arith.select %22, %20, %24 : vector<16x128xi1>, vector<16x128xf32>
    %26 = arith.truncf %25 : vector<16x128xf32> to vector<16x128xbf16>
    %c0_17 = arith.constant 0 : index
    %c0_18 = arith.constant 0 : index
    %27 = vector.load %arg8[%c0_17, %c0_18] : memref<128x256xbf16, #tpu.memory_space<vmem>>, vector<128x256xbf16>
    %cst_19 = arith.constant dense<0.000000e+00> : vector<16x256xf32>
    %28 = tpu.matmul %26, %27, %cst_19 {dimension_numbers = #tpu.dot_dimension_numbers<[1], [0], [0], [1], [0, 0, 1, 1], [], []>} : vector<16x128xbf16>, vector<128x256xbf16>, vector<16x256xf32> -> vector<16x256xf32>
    %29 = vector.extract_strided_slice %28 {offsets = [0, 0], sizes = [16, 128], strides = [1, 1]} : vector<16x256xf32> to vector<16x128xf32>
    %30 = arith.truncf %29 : vector<16x128xf32> to vector<16x128xbf16>
    %cst_20 = arith.constant dense<0.000000e+00> : vector<8x128xf32>
    %31 = tpu.matmul %1, %30, %cst_20 {dimension_numbers = #tpu.dot_dimension_numbers<[1], [0], [0], [1], [0, 0, 1, 1], [], []>} : vector<8x16xbf16>, vector<16x128xbf16>, vector<8x128xf32> -> vector<8x128xf32>
    %32 = vector.broadcast %3 : vector<8x1xf32> to vector<8x128xf32>
    %33 = arith.mulf %31, %32 : vector<8x128xf32>
    %34 = arith.truncf %33 : vector<8x128xf32> to vector<8x128xbf16>
    %cst_21 = arith.constant dense<0.000000e+00> : vector<16x128xf32>
    %35 = tpu.matmul %0, %34, %cst_21 {dimension_numbers = #tpu.dot_dimension_numbers<[1], [0], [0], [1], [0, 0, 1, 1], [], []>} : vector<16x8xbf16>, vector<8x128xbf16>, vector<16x128xf32> -> vector<16x128xf32>
    %36 = vector.broadcast %2 : vector<16x1xf32> to vector<16x128xf32>
    %37 = arith.mulf %35, %36 : vector<16x128xf32>
    %38 = vector.extract_strided_slice %28 {offsets = [0, 128], sizes = [16, 128], strides = [1, 1]} : vector<16x256xf32> to vector<16x128xf32>
    %39 = arith.addf %37, %38 : vector<16x128xf32>
    %c0_22 = arith.constant 0 : index
    %c0_23 = arith.constant 0 : index
    %40 = vector.load %arg9[%c0_22, %c0_23] : memref<1x128xf32, #tpu.memory_space<vmem>>, vector<1x128xf32>
    %41 = vector.broadcast %40 : vector<1x128xf32> to vector<16x128xf32>
    %42 = arith.addf %39, %41 : vector<16x128xf32>
    %cst_24 = arith.constant 0.000000e+00 : f32
    %43 = vector.broadcast %cst_24 : f32 to vector<16x128xf32>
    %44 = arith.cmpf ogt, %42, %43 : vector<16x128xf32>
    %cst_25 = arith.constant 0.00999999977 : f32
    %45 = vector.broadcast %cst_25 : f32 to vector<16x128xf32>
    %46 = arith.mulf %45, %42 : vector<16x128xf32>
    %47 = arith.select %44, %42, %46 : vector<16x128xi1>, vector<16x128xf32>
    %c0_26 = arith.constant 0 : index
    %c0_27 = arith.constant 0 : index
    %48 = vector.load %arg3[%c0_26, %c0_27] : memref<16x16xbf16, #tpu.memory_space<vmem>>, vector<16x16xbf16>
    %49 = arith.truncf %47 : vector<16x128xf32> to vector<16x128xbf16>
    %cst_28 = arith.constant dense<0.000000e+00> : vector<16x128xf32>
    %50 = tpu.matmul %48, %49, %cst_28 {dimension_numbers = #tpu.dot_dimension_numbers<[1], [0], [0], [1], [0, 0, 1, 1], [], []>} : vector<16x16xbf16>, vector<16x128xbf16>, vector<16x128xf32> -> vector<16x128xf32>
    %51 = arith.truncf %50 : vector<16x128xf32> to vector<16x128xbf16>
    %52 = tpu.concatenate %51, %49 in 1 : vector<16x128xbf16>, vector<16x128xbf16> -> vector<16x256xbf16>
    %c0_29 = arith.constant 0 : index
    %c0_30 = arith.constant 0 : index
    %53 = vector.load %arg10[%c0_29, %c0_30] : memref<256x128xbf16, #tpu.memory_space<vmem>>, vector<256x128xbf16>
    %cst_31 = arith.constant dense<0.000000e+00> : vector<16x128xf32>
    %54 = tpu.matmul %52, %53, %cst_31 {dimension_numbers = #tpu.dot_dimension_numbers<[1], [0], [0], [1], [0, 0, 1, 1], [], []>} : vector<16x256xbf16>, vector<256x128xbf16>, vector<16x128xf32> -> vector<16x128xf32>
    %c0_32 = arith.constant 0 : index
    %c0_33 = arith.constant 0 : index
    %55 = vector.load %arg11[%c0_32, %c0_33] : memref<1x128xf32, #tpu.memory_space<vmem>>, vector<1x128xf32>
    %56 = vector.broadcast %55 : vector<1x128xf32> to vector<16x128xf32>
    %57 = arith.addf %54, %56 : vector<16x128xf32>
    %cst_34 = arith.constant 0.000000e+00 : f32
    %58 = vector.broadcast %cst_34 : f32 to vector<16x128xf32>
    %59 = arith.cmpf ogt, %57, %58 : vector<16x128xf32>
    %cst_35 = arith.constant 0.00999999977 : f32
    %60 = vector.broadcast %cst_35 : f32 to vector<16x128xf32>
    %61 = arith.mulf %60, %57 : vector<16x128xf32>
    %62 = arith.select %59, %57, %61 : vector<16x128xi1>, vector<16x128xf32>
    %63 = arith.truncf %62 : vector<16x128xf32> to vector<16x128xbf16>
    %cst_36 = arith.constant dense<0.000000e+00> : vector<16x128xf32>
    %64 = tpu.matmul %48, %63, %cst_36 {dimension_numbers = #tpu.dot_dimension_numbers<[1], [0], [0], [1], [0, 0, 1, 1], [], []>} : vector<16x16xbf16>, vector<16x128xbf16>, vector<16x128xf32> -> vector<16x128xf32>
    %65 = arith.truncf %64 : vector<16x128xf32> to vector<16x128xbf16>
    %66 = tpu.concatenate %65, %63 in 1 : vector<16x128xbf16>, vector<16x128xbf16> -> vector<16x256xbf16>
    %c0_37 = arith.constant 0 : index
    %c0_38 = arith.constant 0 : index
    %67 = vector.load %arg12[%c0_37, %c0_38] : memref<256x128xbf16, #tpu.memory_space<vmem>>, vector<256x128xbf16>
    %cst_39 = arith.constant dense<0.000000e+00> : vector<16x128xf32>
    %68 = tpu.matmul %66, %67, %cst_39 {dimension_numbers = #tpu.dot_dimension_numbers<[1], [0], [0], [1], [0, 0, 1, 1], [], []>} : vector<16x256xbf16>, vector<256x128xbf16>, vector<16x128xf32> -> vector<16x128xf32>
    %c0_40 = arith.constant 0 : index
    %c0_41 = arith.constant 0 : index
    %69 = vector.load %arg13[%c0_40, %c0_41] : memref<1x128xf32, #tpu.memory_space<vmem>>, vector<1x128xf32>
    %70 = vector.broadcast %69 : vector<1x128xf32> to vector<16x128xf32>
    %71 = arith.addf %68, %70 : vector<16x128xf32>
    %cst_42 = arith.constant 0.000000e+00 : f32
    %72 = vector.broadcast %cst_42 : f32 to vector<16x128xf32>
    %73 = arith.cmpf ogt, %71, %72 : vector<16x128xf32>
    %cst_43 = arith.constant 0.00999999977 : f32
    %74 = vector.broadcast %cst_43 : f32 to vector<16x128xf32>
    %75 = arith.mulf %74, %71 : vector<16x128xf32>
    %76 = arith.select %73, %71, %75 : vector<16x128xi1>, vector<16x128xf32>
    %c0_44 = arith.constant 0 : index
    %c0_45 = arith.constant 0 : index
    %77 = vector.load %arg16[%c0_44, %c0_45] : memref<16x128xf32, #tpu.memory_space<vmem>>, vector<16x128xf32>
    tpu.vector_store %arg16[%c0_44, %c0_45], %76 {strides = array<i32>} : memref<16x128xf32, #tpu.memory_space<vmem>>, vector<16x128xf32>,
    %78 = arith.truncf %76 : vector<16x128xf32> to vector<16x128xbf16>
    %c0_46 = arith.constant 0 : index
    %c0_47 = arith.constant 0 : index
    %79 = vector.load %arg14[%c0_46, %c0_47] : memref<128x128xbf16, #tpu.memory_space<vmem>>, vector<128x128xbf16>
    %cst_48 = arith.constant dense<0.000000e+00> : vector<16x128xf32>
    %80 = tpu.matmul %78, %79, %cst_48 {dimension_numbers = #tpu.dot_dimension_numbers<[1], [0], [0], [1], [0, 0, 1, 1], [], []>} : vector<16x128xbf16>, vector<128x128xbf16>, vector<16x128xf32> -> vector<16x128xf32>
    %c0_49 = arith.constant 0 : index
    %c0_50 = arith.constant 0 : index
    %81 = vector.load %arg15[%c0_49, %c0_50] : memref<1x128xf32, #tpu.memory_space<vmem>>, vector<1x128xf32>
    %82 = vector.broadcast %81 : vector<1x128xf32> to vector<16x128xf32>
    %83 = arith.addf %80, %82 : vector<16x128xf32>
    %c0_51 = arith.constant 0 : index
    %c0_52 = arith.constant 0 : index
    %84 = vector.load %arg17[%c0_51, %c0_52] : memref<16x128xf32, #tpu.memory_space<vmem>>, vector<16x128xf32>
    tpu.vector_store %arg17[%c0_51, %c0_52], %83 {strides = array<i32>} : memref<16x128xf32, #tpu.memory_space<vmem>>, vector<16x128xf32>,
    return
  }
}

</mosaic_0001>

<bundles_post_ra>
// kernel: model_forward.1
= control target key start
LH: loop header
LB: loop body
LE: loop exit
PB: predicated region body
PF: predicated region fallthrough
CT: control target
= control target key end

     0   :  { %s1598_s0 = inlined_call_operand.vmem [shape: bf16[16,8], index: 0, kind: input, shape index: {}]   ;;  %s1599_s1 = inlined_call_operand.vmem [shape: bf16[16,8], index: 1, kind: input, shape index: {}]   ;;  %s1600_s2 = inlined_call_operand.vmem [shape: bf16[8,16], index: 2, kind: input, shape index: {}]   ;;  %s1601_s3 = inlined_call_operand.vmem [shape: bf16[16,16], index: 3, kind: input, shape index: {}]   ;;  %s1602_s4 = inlined_call_operand.vmem [shape: f32[16,1], index: 4, kind: input, shape index: {}]   ;;  %s1603_s5 = inlined_call_operand.vmem [shape: f32[8,1], index: 5, kind: input, shape index: {}]   ;;  %s1604_s6 = inlined_call_operand.vmem [shape: bf16[8,256], index: 6, kind: input, shape index: {}]   ;;  %s1605_s7 = inlined_call_operand.vmem [shape: f32[1,128], index: 7, kind: input, shape index: {}]   ;;  %s1606_s8 = inlined_call_operand.vmem [shape: bf16[128,256], index: 8, kind: input, shape index: {}]   ;;  %s1607_s9 = inlined_call_operand.vmem [shape: f32[1,128], index: 9, kind: input, shape index: {}]   ;;  %s1608_s10 = inlined_call_operand.vmem [shape: bf16[256,128], index: 10, kind: input, shape index: {}]   ;;  %s1609_s11 = inlined_call_operand.vmem [shape: f32[1,128], index: 11, kind: input, shape index: {}]   ;;  %s1610_s12 = inlined_call_operand.vmem [shape: bf16[256,128], index: 12, kind: input, shape index: {}]   ;;  %s1611_s13 = inlined_call_operand.vmem [shape: f32[1,128], index: 13, kind: input, shape index: {}]   ;;  %s1612_s14 = inlined_call_operand.vmem [shape: bf16[128,128], index: 14, kind: input, shape index: {}]   ;;  %s1613_s15 = inlined_call_operand.vmem [shape: f32[1,128], index: 15, kind: input, shape index: {}]   ;;  %s1614_s16 = inlined_call_operand.hbm [shape: f32[16,128], index: 16, kind: output, shape index: {0}]   ;;  %s1615_s17 = inlined_call_operand.vmem [shape: f32[16,128], index: 17, kind: output, shape index: {1}]  }
   0x1   :  { %1616 = sst [smem:[#allocation5_spill]] %s1598_s0 }
   0x2   :  { %1617 = sst [smem:[#allocation6_spill]] %s1599_s1 }
   0x3   :  { %v65_v0 = vld [vmem:[%s1604_s6] sm:$0xff]  ;;  %vm80_vm0 = vcmask 1043456  }
   0x4   :  { %v72_v1 = vunpack.c.l.b16 %v65_v0 }
   0x5   :  { %23 = vsyncpa [#allocation3], 0  ;;  %s1618_s28 = sld [smem:[#allocation5_spill]]  ;;  %vm76_vm1 = vcmask 64512   ;;  %v62_v5 = vld [vmem:[%s1603_s5] sm:$0xff]  ;;  %v1216_v6 = vmov 0   ;;  %v73_v12 = vunpack.c.h.b16 %v65_v0 }
   0x6   :  { %v74_v2 = vpack.c.b16 %v72_v1, %v72_v1  ;;  %1183 = vset.pattern.permute.xlu0 %v1216_v6  ;;  %1184 = vset.pattern.permute.xlu1 %v1216_v6  ;;  %v60_v7 = vld [vmem:[%s1602_s4] sm:$0xff]  ;;  %vm116_vm2 = vcmask 130048   ;;  %v61_v15 = vld [vmem:[%s1602_s4 + $0x8] sm:$0xff]  ;;  %v946_v16 = vld [vmem:[%s1606_s8 + $0x70] sm:$0xf]  ;;  %s1619_s1 = sld [smem:[#allocation6_spill]] }
   0x7   :  { %135 = vperm.xlu0 %1183, %v62_v5   ;;  %v1327_v11 = vld [vmem:[%s1600_s2] sm:$0xf]  ;;  %v75_v13 = vpack.c.b16 %v73_v12, %v73_v12  ;;  %v1137_v17 = vld [vmem:[%s1606_s8 + $0x74] sm:$0xf0]  ;;  %172 = vperm.xlu1 %1184, %v61_v15   ;;  %v1136_v19 = vld [vmem:[%s1606_s8 + $0x74] sm:$0xf] }
   0x8   :  { %v82_v3 = vsel %vm80_vm0, %v74_v2, 0  ;;  %v947_v18 = vor.u32 %v1137_v17, %v946_v16  ;;  %v948_v20 = vld [vmem:[%s1606_s8 + $0x78] sm:$0xf0]  ;;  %v938_v21 = vld [vmem:[%s1606_s8 + $0x60] sm:$0xf]  ;;  %s1218_s25 = smov 128  }
   0x9   :  { %94 = vmatpush.bf16.msra.mxu0 %v82_v3  ;;  %v85_v14 = vsel %vm80_vm0, %v75_v13, 0  ;;  %v951_v22 = vor.u32 %v1136_v19, %v948_v20  ;;  %v1135_v23 = vld [vmem:[%s1606_s8 + $0x64] sm:$0xf0]  ;;  %v1134_v24 = vld [vmem:[%s1606_s8 + $0x64] sm:$0xf]  ;;  %s1219_s26 = smov 8  }
   0xa   :  { %108 = vmatpush.bf16.msra.mxu1 %v85_v14  ;;  %v940_v25 = vld [vmem:[%s1606_s8 + $0x68] sm:$0xf0]  ;;  %v939_v26 = vor.u32 %v1135_v23, %v938_v21  ;;  %v930_v35 = vld [vmem:[%s1606_s8 + $0x50] sm:$0xf]  ;;  %v1133_v36 = vld [vmem:[%s1606_s8 + $0x54] sm:$0xf0] }
   0xb   :  { %v1121_v4 = vld [vmem:[%s1618_s28] sm:$0xff]  ;;  %v943_v27 = vor.u32 %v1134_v24, %v940_v25  ;;  %v1132_v37 = vld [vmem:[%s1606_s8 + $0x54] sm:$0xf]  ;;  %v931_v38 = vor.u32 %v1133_v36, %v930_v35  ;;  %v932_v39 = vld [vmem:[%s1606_s8 + $0x58] sm:$0xf0] }
   0xc   :  { %880 = vmatmul.msk.bf16.vlgmr.msra.gmra.mxu0 %vm76_vm1, %v1121_v4  ;;  %v1367_v33 = vld [vmem:[%s1619_s1] sm:$0xff]  ;;  %v935_v40 = vor.u32 %v1132_v37, %v932_v39  ;;  %v1131_v42 = vld [vmem:[%s1606_s8 + $0x44] sm:$0xf0]  ;;  %v924_v45 = vld [vmem:[%s1606_s8 + $0x48] sm:$0xf0] }
   0xd   :  { %881 = vmatmul.msk.bf16.vlgmr.msra.gmra.mxu1 %vm76_vm1, %v1121_v4  ;;  %288 = vmatpush.bf16.msrb.mxu0 %v947_v18  ;;  %v922_v41 = vld [vmem:[%s1606_s8 + $0x40] sm:$0xf]  ;;  %v1130_v43 = vld [vmem:[%s1606_s8 + $0x44] sm:$0xf]  ;;  %v914_v47 = vld [vmem:[%s1606_s8 + $0x30] sm:$0xf] }
   0xe   :  { %302 = vmatpush.bf16.msrb.mxu1 %v951_v22  ;;  %v923_v44 = vor.u32 %v1131_v42, %v922_v41  ;;  %v927_v46 = vor.u32 %v1130_v43, %v924_v45  ;;  %v1129_v48 = vld [vmem:[%s1606_s8 + $0x34] sm:$0xf0]  ;;  %v1128_v49 = vld [vmem:[%s1606_s8 + $0x34] sm:$0xf]  ;;  %v916_v51 = vld [vmem:[%s1606_s8 + $0x38] sm:$0xf0] }
   0xf   :  { %167 = vperm.xlu0 %1183, %v60_v7   ;;  %v915_v50 = vor.u32 %v1129_v48, %v914_v47  ;;  %v919_v52 = vor.u32 %v1128_v49, %v916_v51  ;;  %v906_v53 = vld [vmem:[%s1606_s8 + $0x20] sm:$0xf]  ;;  %v1127_v54 = vld [vmem:[%s1606_s8 + $0x24] sm:$0xf0]  ;;  %v1126_v55 = vld [vmem:[%s1606_s8 + $0x24] sm:$0xf] }
  0x10   :  { %v907_v56 = vor.u32 %v1127_v54, %v906_v53  ;;  %v908_v57 = vld [vmem:[%s1606_s8 + $0x28] sm:$0xf0]  ;;  %v898_v59 = vld [vmem:[%s1606_s8 + $0x10] sm:$0xf]  ;;  %v1125_v60 = vld [vmem:[%s1606_s8 + $0x14] sm:$0xf0] }
  0x11   :  { %289 = vmatpush.bf16.msrb.mxu0 %v939_v26  ;;  %v911_v58 = vor.u32 %v1126_v55, %v908_v57  ;;  %v1124_v61 = vld [vmem:[%s1606_s8 + $0x14] sm:$0xf]  ;;  %v899_v62 = vor.u32 %v1125_v60, %v898_v59  ;;  %v900_v63 = vld [vmem:[%s1606_s8 + $0x18] sm:$0xf0]  ;;  %v890_v1 = vld [vmem:[%s1606_s8] sm:$0xf] }
  0x12   :  { %303 = vmatpush.bf16.msrb.mxu1 %v943_v27  ;;  %v903_v0 = vor.u32 %v1124_v61, %v900_v63  ;;  %v1123_v2 = vld [vmem:[%s1606_s8 + $0x4] sm:$0xf0]  ;;  %v1122_v3 = vld [vmem:[%s1606_s8 + $0x4] sm:$0xf]  ;;  %v892_v5 = vld [vmem:[%s1606_s8 + $0x8] sm:$0xf0] }
  0x13   :  { %v891_v4 = vor.u32 %v1123_v2, %v890_v1  ;;  %v895_v6 = vor.u32 %v1122_v3, %v892_v5  ;;  %v1185_v13 = vld [vmem:[%s1605_s7] ss:$0 sm:$0xff]  ;;  %v1149_v39 = vld [vmem:[%s1608_s10 + $0x50] sm:$0xff]  ;;  %v1146_v41 = vld [vmem:[%s1608_s10 + $0x38] sm:$0xff] }
  0x14   :  { %v1145_v42 = vld [vmem:[%s1608_s10 + $0x30] sm:$0xff]  ;;  %v1138_v63 = vld [vmem:[%s1601_s3] sm:$0xff]  ;;  %v1142_v2 = vld [vmem:[%s1608_s10 + $0x18] sm:$0xff] }
  0x15   :  { %290 = vmatpush.bf16.msrb.mxu0 %v931_v38  ;;  %v1151_v38 = vld [vmem:[%s1608_s10 + $0x60] sm:$0xff]  ;;  %v1141_v3 = vld [vmem:[%s1608_s10 + $0x10] sm:$0xff] }
  0x16   :  { %304 = vmatpush.bf16.msrb.mxu1 %v935_v40  ;;  %v1147_v40 = vld [vmem:[%s1608_s10 + $0x40] sm:$0xff] }
  0x17   :  { %v1143_v1 = vld [vmem:[%s1608_s10 + $0x20] sm:$0xff] }
  0x18   :  { %v1139_v5 = vld [vmem:[%s1608_s10] sm:$0xff] }
  0x19   :  { %291 = vmatpush.bf16.msrb.mxu0 %v923_v44 }
  0x1a   :  { %305 = vmatpush.bf16.msrb.mxu1 %v927_v46  ;;  %v1186_v46 = vld [vmem:[%s1607_s9] ss:$0 sm:$0xff] }
  0x1d   :  { %292 = vmatpush.bf16.msrb.mxu0 %v915_v50 }
  0x1e   :  { %306 = vmatpush.bf16.msrb.mxu1 %v919_v52 }
  0x21   :  { %293 = vmatpush.bf16.msrb.mxu0 %v907_v56 }
  0x22   :  { %307 = vmatpush.bf16.msrb.mxu1 %v911_v58 }
  0x25   :  { %294 = vmatpush.bf16.msrb.mxu0 %v899_v62 }
  0x26   :  { %308 = vmatpush.bf16.msrb.mxu1 %v903_v0  ;;  %v1144_v0 = vld [vmem:[%s1608_s10 + $0x28] sm:$0xff] }
  0x29   :  { %295 = vmatpush.bf16.msrb.mxu0 %v891_v4  ;;  %v1140_v4 = vld [vmem:[%s1608_s10 + $0x8] sm:$0xff] }
  0x2a   :  { %309 = vmatpush.bf16.msrb.mxu1 %v895_v6 }
  0x79   :  { %v1360_v28 = vpop.permute.xlu0 %135  ;;  %v173_v14 = vpop.permute.xlu1 %172 }
  0x81   :  { %v168_v7 = vpop.permute.xlu0 %167 }
  0x89   :  { %v96_v8 = vpop.f32.mrf.mxu0 }
  0x91   :  { %v98_v9 = vpop.f32.mrf.mxu0 }
  0x92   :  { %v115_v10 = vpack.c.bf16 %v98_v9, %v96_v8  ;;  %v110_v8 = vpop.f32.mrf.mxu1 }
  0x94   :  { %127 = vmatpush.bf16.msra.mxu2 %v115_v10 }
  0x97   :  { %882 = vmatmul.msk.bf16.vlgmr.msra.gmra.mxu2 %vm116_vm2, %v1327_v11 }
  0x9a   :  { %v112_v18 = vpop.f32.mrf.mxu1 }
 0x11a   :  { %v129_v29 = vpop.f32.mrf.mxu2 }
 0x11b   :  { %v138_v30 = vmul.f32 %v1360_v28, %v129_v29 }
 0x11d   :  { %v139_v31 = vpack.c.bf16 %v138_v30, %v138_v30  ;;  %v1154_v30 = vld [vmem:[%s1608_s10 + $0x78] sm:$0xff] }
 0x11e   :  { %551 = vmatpush.bf16.msra.mxu0 %v1154_v30 }
 0x11f   :  { %v149_v32 = vsel %vm80_vm0, %v139_v31, 0  ;;  %v1153_v31 = vld [vmem:[%s1608_s10 + $0x70] sm:$0xff] }
 0x120   :  { %158 = vmatpush.bf16.msra.mxu3 %v149_v32 }
 0x122   :  { %v131_v34 = vpop.f32.mrf.mxu2  ;;  %552 = vmatpush.bf16.msra.mxu0 %v1153_v31 }
 0x123   :  { %887 = vmatmul.msk.bf16.vlgmr.msra.gmra.mxu3 %vm76_vm1, %v1367_v33 }
 0x1a6   :  { %v160_v9 = vpop.f32.mrf.mxu3 }
 0x1a7   :  { %v175_v10 = vmul.f32 %v168_v7, %v160_v9 }
 0x1a9   :  { %v177_v12 = vadd.f32 %v175_v10, %v110_v8 }
 0x1ab   :  { %v183_v16 = vadd.f32 %v1185_v13, %v177_v12 }
 0x1ad   :  { %v187_v20 = vmul.f32 0.01, %v183_v16  ;;  %vm185_vm3 = vcmp.gt.f32.partialorder %v183_v16, 0.0 }
 0x1ae   :  { %v162_v15 = vpop.f32.mrf.mxu3 }
 0x1af   :  { %v176_v17 = vmul.f32 %v173_v14, %v162_v15  ;;  %v189_v23 = vsel %vm185_vm3, %v183_v16, %v187_v20 }
 0x1b1   :  { %v178_v19 = vadd.f32 %v176_v17, %v112_v18 }
 0x1b3   :  { %v184_v21 = vadd.f32 %v1185_v13, %v178_v19 }
 0x1b5   :  { %v188_v22 = vmul.f32 0.01, %v184_v21  ;;  %vm186_vm4 = vcmp.gt.f32.partialorder %v184_v21, 0.0 }
 0x1b7   :  { %v190_v24 = vsel %vm186_vm4, %v184_v21, %v188_v22 }
 0x1b8   :  { %v191_v25 = vpack.c.bf16 %v190_v24, %v189_v23 }
 0x1ba   :  { %296 = vmatmul.bf16.vlgmr.msrb.gmra.mxu0 %v191_v25  ;;  %310 = vmatmul.bf16.vlgmr.msrb.gmra.mxu1 %v191_v25 }
 0x237   :  { %v297_v26 = vpop.f32.mrf.mxu0  ;;  %v311_v43 = vpop.f32.mrf.mxu1 }
 0x23f   :  { %v299_v27 = vpop.f32.mrf.mxu0  ;;  %v313_v52 = vpop.f32.mrf.mxu1 }
 0x240   :  { %v316_v29 = vpack.c.bf16 %v299_v27, %v297_v26 }
 0x242   :  { %324 = vmatpush.bf16.msrb.mxu2 %v316_v29 }
 0x245   :  { %952 = vmatmul.msk.bf16.vlgmr.msrb.gmra.mxu2 %vm116_vm2, %v1327_v11  ;;  %v1152_v11 = vld [vmem:[%s1608_s10 + $0x68] sm:$0xff] }
 0x246   :  { %553 = vmatpush.bf16.msra.mxu0 %v1152_v11  ;;  %v1168_v11 = vld [vmem:[%s1610_s12 + $0x68] sm:$0xff] }
 0x24a   :  { %554 = vmatpush.bf16.msra.mxu0 %v1151_v38  ;;  %v1160_v38 = vld [vmem:[%s1610_s12 + $0x28] sm:$0xff] }
 0x2c8   :  { %v326_v32 = vpop.f32.mrf.mxu2 }
 0x2c9   :  { %v330_v34 = vmul.f32 %v326_v32, %v1360_v28  ;;  %v1150_v28 = vld [vmem:[%s1608_s10 + $0x58] sm:$0xff] }
 0x2ca   :  { %555 = vmatpush.bf16.msra.mxu0 %v1150_v28  ;;  %v1170_v32 = vld [vmem:[%s1610_s12 + $0x78] sm:$0xff]  ;;  %v1167_v28 = vld [vmem:[%s1610_s12 + $0x60] sm:$0xff] }
 0x2cb   :  { %v331_v35 = vpack.c.bf16 %v330_v34, %v330_v34 }
 0x2cd   :  { %v333_v36 = vsel %vm80_vm0, %v331_v35, 0  ;;  %v1162_v35 = vld [vmem:[%s1610_s12 + $0x38] sm:$0xff] }
 0x2ce   :  { %342 = vmatpush.bf16.msrb.mxu3 %v333_v36  ;;  %556 = vmatpush.bf16.msra.mxu0 %v1149_v39  ;;  %v1169_v36 = vld [vmem:[%s1610_s12 + $0x70] sm:$0xff]  ;;  %v1159_v39 = vld [vmem:[%s1610_s12 + $0x20] sm:$0xff] }
 0x2d0   :  { %v328_v37 = vpop.f32.mrf.mxu2 }
 0x2d1   :  { %953 = vmatmul.msk.bf16.vlgmr.msrb.gmra.mxu3 %vm76_vm1, %v1367_v33  ;;  %v1148_v33 = vld [vmem:[%s1608_s10 + $0x48] sm:$0xff]  ;;  %v1161_v37 = vld [vmem:[%s1610_s12 + $0x30] sm:$0xff] }
 0x2d2   :  { %557 = vmatpush.bf16.msra.mxu0 %v1148_v33  ;;  %537 = vmatpush.bf16.msra.mxu3 %v1146_v41  ;;  %v1166_v33 = vld [vmem:[%s1610_s12 + $0x58] sm:$0xff]  ;;  %v1164_v41 = vld [vmem:[%s1610_s12 + $0x48] sm:$0xff] }
 0x2d6   :  { %558 = vmatpush.bf16.msra.mxu0 %v1147_v40  ;;  %538 = vmatpush.bf16.msra.mxu3 %v1145_v42  ;;  %v1165_v40 = vld [vmem:[%s1610_s12 + $0x50] sm:$0xff]  ;;  %v1163_v42 = vld [vmem:[%s1610_s12 + $0x40] sm:$0xff] }
 0x2da   :  { %539 = vmatpush.bf16.msra.mxu3 %v1144_v0 }
 0x2de   :  { %540 = vmatpush.bf16.msra.mxu3 %v1143_v1 }
 0x2e2   :  { %541 = vmatpush.bf16.msra.mxu3 %v1142_v2 }
 0x2e6   :  { %542 = vmatpush.bf16.msra.mxu3 %v1141_v3 }
 0x2ea   :  { %543 = vmatpush.bf16.msra.mxu3 %v1140_v4 }
 0x2ee   :  { %544 = vmatpush.bf16.msra.mxu3 %v1139_v5 }
 0x354   :  { %v344_v44 = vpop.f32.mrf.mxu3 }
 0x355   :  { %v349_v45 = vmul.f32 %v344_v44, %v168_v7  ;;  %v1157_v44 = vld [vmem:[%s1610_s12 + $0x10] sm:$0xff] }
 0x357   :  { %v351_v47 = vadd.f32 %v349_v45, %v311_v43  ;;  %v1158_v43 = vld [vmem:[%s1610_s12 + $0x18] sm:$0xff]  ;;  %v1156_v45 = vld [vmem:[%s1610_s12 + $0x8] sm:$0xff] }
 0x359   :  { %v357_v48 = vadd.f32 %v1186_v46, %v351_v47 }
 0x35b   :  { %v361_v50 = vmul.f32 0.01, %v357_v48  ;;  %vm359_vm5 = vcmp.gt.f32.partialorder %v357_v48, 0.0 }
 0x35c   :  { %v346_v49 = vpop.f32.mrf.mxu3 }
 0x35d   :  { %v350_v51 = vmul.f32 %v346_v49, %v173_v14  ;;  %v363_v54 = vsel %vm359_vm5, %v357_v48, %v361_v50  ;;  %v1187_v14 = vld [vmem:[%s1609_s11] ss:$0 sm:$0xff]  ;;  %v1178_v48 = vld [vmem:[%s1612_s14 + $0x38] sm:$0xff]  ;;  %v1177_v50 = vld [vmem:[%s1612_s14 + $0x30] sm:$0xff]  ;;  %s860_s11 = sshll.u32 %s1614_s16, 4  ;;  %s861_s11 = int_to_ptr.hbm [resolvable:$true] %s860_s11 }
 0x35e   :  { %v367_v57 = vpack.c.bf16 %v363_v54, %v363_v54  ;;  %838 = vmatpush.bf16.msrb.mxu3 %v1178_v48 }
 0x35f   :  { %v352_v53 = vadd.f32 %v350_v51, %v313_v52 }
 0x360   :  { %v376_v60 = vunpack.c.l.b16 %v367_v57  ;;  %v1175_v57 = vld [vmem:[%s1612_s14 + $0x20] sm:$0xff] }
 0x361   :  { %v358_v55 = vadd.f32 %v1186_v46, %v352_v53  ;;  %v1155_v46 = vld [vmem:[%s1610_s12] sm:$0xff] }
 0x362   :  { %839 = vmatpush.bf16.msrb.mxu3 %v1177_v50 }
 0x363   :  { %vm360_vm6 = vcmp.gt.f32.partialorder %v358_v55, 0.0  ;;  %v362_v56 = vmul.f32 0.01, %v358_v55 }
 0x365   :  { %v364_v58 = vsel %vm360_vm6, %v358_v55, %v362_v56  ;;  %v1176_v55 = vld [vmem:[%s1612_s14 + $0x28] sm:$0xff] }
 0x366   :  { %v368_v59 = vpack.c.bf16 %v364_v58, %v364_v58  ;;  %840 = vmatpush.bf16.msrb.mxu3 %v1176_v55  ;;  %v1174_v58 = vld [vmem:[%s1612_s14 + $0x18] sm:$0xff] }
 0x368   :  { %v377_v61 = vunpack.c.l.b16 %v368_v59  ;;  %v1173_v59 = vld [vmem:[%s1612_s14 + $0x10] sm:$0xff] }
 0x36a   :  { %v378_v62 = vpack.c.b16 %v377_v61, %v376_v60  ;;  %841 = vmatpush.bf16.msrb.mxu3 %v1175_v57  ;;  %v1172_v60 = vld [vmem:[%s1612_s14 + $0x8] sm:$0xff]  ;;  %v1171_v61 = vld [vmem:[%s1612_s14] sm:$0xff]  ;;  %s1217_s14 = smov [#allocation2]  }
 0x36c   :  { %390 = vmatpush.bf16.msra.mxu2 %v378_v62  ;;  %559 = vmatmul.bf16.vlgmr.msra.gmra.mxu0 %v378_v62  ;;  %v1188_v62 = vld [vmem:[%s1611_s13] ss:$0 sm:$0xff]  ;;  %s858_s13 = sshll.u32 %s1217_s14, 4  ;;  %s859_s13 = int_to_ptr.vmem [resolvable:$true] %s858_s13 }
 0x36e   :  { %842 = vmatpush.bf16.msrb.mxu3 %v1174_v58 }
 0x36f   :  { %958 = vmatmul.msk.bf16.vlgmr.msra.gmra.mxu2 %vm116_vm2, %v1138_v63 }
 0x370   :  { %733 = vmatpush.bf16.msrb.mxu2 %v1162_v35 }
 0x372   :  { %843 = vmatpush.bf16.msrb.mxu3 %v1173_v59 }
 0x374   :  { %734 = vmatpush.bf16.msrb.mxu2 %v1161_v37 }
 0x376   :  { %844 = vmatpush.bf16.msrb.mxu3 %v1172_v60 }
 0x378   :  { %735 = vmatpush.bf16.msrb.mxu2 %v1160_v38 }
 0x37a   :  { %845 = vmatpush.bf16.msrb.mxu3 %v1171_v61 }
 0x37c   :  { %736 = vmatpush.bf16.msrb.mxu2 %v1159_v39 }
 0x380   :  { %737 = vmatpush.bf16.msrb.mxu2 %v1158_v43 }
 0x384   :  { %738 = vmatpush.bf16.msrb.mxu2 %v1157_v44 }
 0x388   :  { %739 = vmatpush.bf16.msrb.mxu2 %v1156_v45 }
 0x38c   :  { %740 = vmatpush.bf16.msrb.mxu2 %v1155_v46 }
 0x3e9   :  { %v560_v15 = vpop.f32.mrf.mxu0 }
 0x3f1   :  { %v562_v22 = vpop.f32.mrf.mxu0 }
 0x3f2   :  { %v392_v6 = vpop.f32.mrf.mxu2 }
 0x3f3   :  { %v397_v7 = vpack.c.bf16 %v392_v6, %v392_v6 }
 0x3f5   :  { %v401_v10 = vunpack.c.l.b16 %v397_v7 }
 0x3fa   :  { %v394_v8 = vpop.f32.mrf.mxu2 }
 0x3fb   :  { %v398_v9 = vpack.c.bf16 %v394_v8, %v394_v8 }
 0x3fd   :  { %v402_v12 = vunpack.c.l.b16 %v398_v9 }
 0x3ff   :  { %v403_v13 = vpack.c.b16 %v402_v12, %v401_v10 }
 0x401   :  { %545 = vmatmul.bf16.vlgmr.msra.gmra.mxu3 %v403_v13  ;;  %v1189_v13 = vld [vmem:[%s1613_s15] ss:$0 sm:$0xff] }
 0x484   :  { %v546_v16 = vpop.f32.mrf.mxu3 }
 0x485   :  { %v547_v17 = vadd.f32 %v1187_v14, %v546_v16 }
 0x487   :  { %v561_v18 = vadd.f32 %v560_v15, %v547_v17 }
 0x489   :  { %v567_v19 = vmul.f32 0.01, %v561_v18  ;;  %vm565_vm7 = vcmp.gt.f32.partialorder %v561_v18, 0.0 }
 0x48b   :  { %v569_v23 = vsel %vm565_vm7, %v561_v18, %v567_v19 }
 0x48c   :  { %v548_v20 = vpop.f32.mrf.mxu3  ;;  %v571_v26 = vpack.c.bf16 %v569_v23, %v569_v23 }
 0x48d   :  { %v549_v21 = vadd.f32 %v1187_v14, %v548_v20 }
 0x48e   :  { %v575_v30 = vunpack.c.l.b16 %v571_v26 }
 0x48f   :  { %v563_v24 = vadd.f32 %v562_v22, %v549_v21 }
 0x491   :  { %vm566_vm8 = vcmp.gt.f32.partialorder %v563_v24, 0.0  ;;  %v568_v25 = vmul.f32 0.01, %v563_v24 }
 0x493   :  { %v570_v27 = vsel %vm566_vm8, %v563_v24, %v568_v25 }
 0x494   :  { %v572_v29 = vpack.c.bf16 %v570_v27, %v570_v27 }
 0x496   :  { %v576_v31 = vunpack.c.l.b16 %v572_v29 }
 0x498   :  { %v577_v34 = vpack.c.b16 %v576_v31, %v575_v30 }
 0x49a   :  { %586 = vmatpush.bf16.msra.mxu1 %v577_v34 }
 0x49d   :  { %1023 = vmatmul.msk.bf16.vlgmr.msra.gmra.mxu1 %vm116_vm2, %v1138_v63 }
 0x49e   :  { %747 = vmatpush.bf16.msrb.mxu1 %v1170_v32 }
 0x4a2   :  { %748 = vmatpush.bf16.msrb.mxu1 %v1169_v36 }
 0x4a6   :  { %749 = vmatpush.bf16.msrb.mxu1 %v1168_v11 }
 0x4aa   :  { %750 = vmatpush.bf16.msrb.mxu1 %v1167_v28 }
 0x4ae   :  { %751 = vmatpush.bf16.msrb.mxu1 %v1166_v33 }
 0x4b2   :  { %752 = vmatpush.bf16.msrb.mxu1 %v1165_v40 }
 0x4b6   :  { %753 = vmatpush.bf16.msrb.mxu1 %v1164_v41 }
 0x4ba   :  { %754 = vmatpush.bf16.msrb.mxu1 %v1163_v42 }
 0x4bd   :  { %755 = vmatmul.bf16.vlgmr.msrb.gmra.mxu1 %v577_v34 }
 0x51a   :  { %v588_v47 = vpop.f32.mrf.mxu1 }
 0x51b   :  { %v593_v49 = vpack.c.bf16 %v588_v47, %v588_v47 }
 0x51d   :  { %v597_v53 = vunpack.c.l.b16 %v593_v49 }
 0x522   :  { %v590_v51 = vpop.f32.mrf.mxu1 }
 0x523   :  { %v594_v52 = vpack.c.bf16 %v590_v51, %v590_v51 }
 0x525   :  { %v598_v54 = vunpack.c.l.b16 %v594_v52 }
 0x527   :  { %v599_v56 = vpack.c.b16 %v598_v54, %v597_v53 }
 0x529   :  { %741 = vmatmul.bf16.vlgmr.msrb.gmra.mxu2 %v599_v56 }
 0x53a   :  { %v756_v63 = vpop.f32.mrf.mxu1 }
 0x542   :  { %v758_v7 = vpop.f32.mrf.mxu1 }
 0x5ac   :  { %v742_v0 = vpop.f32.mrf.mxu2 }
 0x5ad   :  { %v743_v1 = vadd.f32 %v1188_v62, %v742_v0 }
 0x5af   :  { %v757_v2 = vadd.f32 %v756_v63, %v743_v1 }
 0x5b1   :  { %vm761_vm9 = vcmp.gt.f32.partialorder %v757_v2, 0.0  ;;  %v763_v3 = vmul.f32 0.01, %v757_v2 }
 0x5b3   :  { %v765_v4 = vsel %vm761_vm9, %v757_v2, %v763_v3 }
 0x5b4   :  { %767 = vst [vmem:[#allocation2] sm:$0xff] %v765_v4  ;;  %v744_v5 = vpop.f32.mrf.mxu2 }
 0x5b5   :  { %v745_v6 = vadd.f32 %v1188_v62, %v744_v5 }
 0x5b7   :  { %v759_v8 = vadd.f32 %v758_v7, %v745_v6 }
 0x5b9   :  { %vm762_vm10 = vcmp.gt.f32.partialorder %v759_v8, 0.0  ;;  %v764_v9 = vmul.f32 0.01, %v759_v8 }
 0x5bb   :  { %v766_v10 = vsel %vm762_vm10, %v759_v8, %v764_v9 }
 0x5bc   :  { %768 = vst [vmem:[#allocation2 + $0x8] sm:$0xff] %v766_v10  ;;  %v769_v12 = vpack.c.bf16 %v766_v10, %v765_v4 }
 0x5bd   :  { %866 = dma.vmem_to_hbm [thread:$0]  %s859_s13, 256, %s861_s11, [#allocation3], %s1218_s25, %s1218_s25, %s1219_s26  }
 0x5be   :  { %846 = vmatmul.bf16.vlgmr.msrb.gmra.mxu3 %v769_v12 }
 0x641   :  { %v847_v14 = vpop.f32.mrf.mxu3 }
 0x642   :  { %v848_v15 = vadd.f32 %v1189_v13, %v847_v14 }
 0x644   :  { %852 = vst [vmem:[%s1615_s17] sm:$0xff] %v848_v15 }
 0x649   :  { %v849_v16 = vpop.f32.mrf.mxu3 }
 0x64a   :  { %v850_v17 = vadd.f32 %v1189_v13, %v849_v16 }
 0x64c   :  { %853 = vst [vmem:[%s1615_s17 + $0x8] sm:$0xff] %v850_v17 }
 0x64d   :  { %1214 = dma.done.wait [#allocation3], 256  }
 0x64e   :  { %1215 = vsyncadd [#allocation3], 4294967040 }
 0x64f   :  { %875 = vsyncpa [#allocation3], 1 }

</bundles_post_ra>
